<compile_context>
chip_gen: v6e
topology: v6e:2x2x1
jax: 0.10.0
libtpu: 0.0.40
codegen_flags: <defaults>
</compile_context>

<pallas_src>
import functools

import jax
import jax.numpy as jnp
from jax.experimental import pallas as pl
from jax.experimental.pallas import tpu as pltpu


def _round_up(x, m):
    return (x + m - 1) // m * m


def sideout_kernel(x_ref, w1f_ref, shift_ref, w2t_ref, b2_ref, o_ref, col_ref, *, wp):
    # x_ref:     (Cin, Min)         spatially padded, row-flattened, batch-concatenated input
    # w1f_ref:   (Cmid_p, 9*Cin)    3x3 weights, BN scale folded in, im2col-row-major, row-padded
    # shift_ref: (Cmid_p, 1)        folded BN shift (includes conv1 bias), f32
    # w2t_ref:   (Cout_p, Cmid_p)   1x1 conv weights, transposed, zero-padded
    # b2_ref:    (Cout_p, 1)        1x1 conv bias, zero-padded, f32
    # o_ref:     (Cout_p, Mout)     sublane- and lane-dense output slab (wrapper slices real rows)
    # col_ref:   (9*Cin, Mout)      VMEM im2col scratch
    mout = o_ref.shape[1]
    cin = x_ref.shape[0]

    # im2col: materialize each tap's lane-shifted slice of the flat input EXACTLY ONCE.
    # Offsets are static and the slices are contiguous along lanes (no strided reads/reshapes).
    for kh in range(3):
        for kw in range(3):
            t = kh * 3 + kw
            off = kh * wp + kw
            col_ref[pl.ds(t * cin, cin), :] = x_ref[:, pl.ds(off, mout)]

    # 3x3 conv: a single contraction-(9*Cin) MXU matmul with f32 accumulation.
    acc = jnp.dot(w1f_ref[...], col_ref[...], preferred_element_type=jnp.float32)

    # Folded eval-mode BN shift (+ conv1 bias) and ReLU, in f32 on the VPU.
    y = jnp.maximum(acc + shift_ref[...], 0.0)

    # Dropout2d(0.1) is identity in eval mode.
    # TODO(synk): training-mode Dropout2d (whole-channel masking via pltpu.prng_*) not implemented.

    # 1x1 conv == (Cout_p, Cmid_p) @ (Cmid_p, Mout) + bias; unmasked sublane/lane-dense store.
    out = jnp.dot(w2t_ref[...], y.astype(w2t_ref.dtype),
                  preferred_element_type=jnp.float32) + b2_ref[...]
    o_ref[...] = out.astype(o_ref.dtype)


def sideout_block(x_nchw, w1_hwio, b1, bn_gamma, bn_beta, bn_mean, bn_var,
                  w2_io, b2, *, eps=1e-5, matmul_dtype=jnp.bfloat16):
    """SideoutBlock forward (eval mode). x_nchw: (N, Cin, H, W) f32 -> (N, Cout, H, W) f32."""
    N, Cin, H, W = x_nchw.shape
    Cmid = w1_hwio.shape[3]
    Cout = w2_io.shape[1]
    Hp, Wp = H + 2, W + 2
    Lp = Hp * Wp
    off_max = 2 * Wp + 2                        # largest tap offset
    Mout = _round_up(N * Lp, 128)               # lane-dense output width
    Min = _round_up(Mout + off_max, 128)        # input width incl. tap halo + tail zeros
    Cmid_p = _round_up(Cmid, 8)                 # sublane-dense intermediate rows
    Cout_p = _round_up(Cout, 8)                 # sublane-dense output rows (unmasked stores)

    # ---- wrapper glue (layout plumbing only) ----
    # NCHW -> channel-major -> flatten batch+spatial onto the lane axis.  Halo/tail pads fuse with
    # this (unavoidable) relayout pass in XLA.
    x_pad = jnp.pad(x_nchw, ((0, 0), (0, 0), (1, 1), (1, 1)))           # (N, Cin, Hp, Wp)
    x_flat = jnp.transpose(x_pad, (1, 0, 2, 3)).reshape(Cin, N * Lp)    # (Cin, N*Lp)
    x_flat = jnp.pad(x_flat, ((0, 0), (0, Min - N * Lp)))               # (Cin, Min)

    # Fold conv1 bias + eval-mode BN into the 3x3 weights (scale) and a per-channel shift.
    scale = bn_gamma / jnp.sqrt(bn_var + eps)                           # (Cmid,)
    shift = bn_beta + (b1 - bn_mean) * scale                            # (Cmid,)
    # (3,3,Cin,Cmid) -> (Cmid, 3,3,Cin) -> (Cmid, 9*Cin); column t*Cin + c matches im2col row
    # block t = kh*3 + kw, channel c.  Pad rows to Cmid_p with zeros.
    w1f = jnp.transpose(w1_hwio * scale[None, None, None, :],
                        (3, 0, 1, 2)).reshape(Cmid, 9 * Cin)
    w1f = jnp.pad(w1f, ((0, Cmid_p - Cmid), (0, 0)))                    # (Cmid_p, 9*Cin)
    shift_p = jnp.pad(shift, (0, Cmid_p - Cmid)).reshape(Cmid_p, 1)     # (Cmid_p, 1)
    w2t = jnp.transpose(w2_io)                                          # (Cout, Cmid)
    w2t_p = jnp.pad(w2t, ((0, Cout_p - Cout), (0, Cmid_p - Cmid)))      # (Cout_p, Cmid_p)
    b2_p = jnp.pad(b2, (0, Cout_p - Cout)).reshape(Cout_p, 1)           # (Cout_p, 1)

    x_flat = x_flat.astype(matmul_dtype)
    w1f = w1f.astype(matmul_dtype)
    w2t_p = w2t_p.astype(matmul_dtype)
    shift_p = shift_p.astype(jnp.float32)
    b2_p = b2_p.astype(jnp.float32)

    kernel = functools.partial(sideout_kernel, wp=Wp)

    # Single invocation (no grid): full arrays mapped straight into VMEM, no dead double-buffering.
    out_flat = pl.pallas_call(
        kernel,
        out_shape=jax.ShapeDtypeStruct((Cout_p, Mout), jnp.float32),
        in_specs=[pl.BlockSpec(memory_space=pltpu.MemorySpace.VMEM)] * 5,
        out_specs=pl.BlockSpec(memory_space=pltpu.MemorySpace.VMEM),
        scratch_shapes=[pltpu.VMEM((9 * Cin, Mout), matmul_dtype)],
    )(x_flat, w1f, shift_p, w2t_p, b2_p)

    # Valid outputs live at flat position n*Lp + r*Wp + c for r<H, c<W (top-left of each padded
    # grid); padding rows/cols, tail lanes and dead sublane rows are garbage and dropped here.
    out = out_flat[:Cout, :N * Lp].reshape(Cout, N, Hp, Wp)[:, :, :H, :W]  # (Cout, N, H, W)
    return jnp.transpose(out, (1, 0, 2, 3))                                # (N, Cout, H, W)


def reference(x_nchw, w1_hwio, b1, bn_gamma, bn_beta, bn_mean, bn_var, w2_io, b2, eps=1e-5):
    """Pure-JAX reference for validation."""
    x = jnp.transpose(x_nchw, (0, 2, 3, 1))
    y = jax.lax.conv_general_dilated(
        x, w1_hwio, window_strides=(1, 1), padding=((1, 1), (1, 1)),
        dimension_numbers=("NHWC", "HWIO", "NHWC")) + b1
    scale = bn_gamma / jnp.sqrt(bn_var + eps)
    y = (y - bn_mean) * scale + bn_beta
    y = jnp.maximum(y, 0.0)
    y = jnp.einsum("nhwc,cd->nhwd", y, w2_io) + b2
    return jnp.transpose(y, (0, 3, 1, 2))


if __name__ == "__main__":
    # Shapes consistent with the module: in_channels=8 -> mid=2, out_channels=4.
    N, Cin, H, W = 2, 8, 16, 16
    Cmid, Cout = Cin // 4, 4

    key = jax.random.PRNGKey(0)
    ks = jax.random.split(key, 9)
    x = jax.random.normal(ks[0], (N, Cin, H, W), jnp.float32)
    w1 = jax.random.normal(ks[1], (3, 3, Cin, Cmid), jnp.float32) * 0.1   # HWIO
    b1 = jax.random.normal(ks[2], (Cmid,), jnp.float32) * 0.1
    # Non-trivial eval-mode BatchNorm statistics (exercise the folding path).
    bn_gamma = 1.0 + 0.1 * jax.random.normal(ks[3], (Cmid,), jnp.float32)
    bn_beta = 0.1 * jax.random.normal(ks[4], (Cmid,), jnp.float32)
    bn_mean = 0.1 * jax.random.normal(ks[5], (Cmid,), jnp.float32)
    bn_var = 0.5 + jnp.abs(jax.random.normal(ks[6], (Cmid,), jnp.float32))
    w2 = jax.random.normal(ks[7], (Cmid, Cout), jnp.float32) * 0.1        # 1x1 conv (IO)
    b2 = jax.random.normal(ks[8], (Cout,), jnp.float32) * 0.1

    ref = reference(x, w1, b1, bn_gamma, bn_beta, bn_mean, bn_var, w2, b2)

    # f32 operand path: tight check of the kernel math (im2col fusion, folding, padding, slicing).
    out_f32 = sideout_block(x, w1, b1, bn_gamma, bn_beta, bn_mean, bn_var, w2, b2,
                            matmul_dtype=jnp.float32)
    out_f32 = jax.block_until_ready(out_f32)
    assert out_f32.shape == (N, Cout, H, W)
    assert jnp.allclose(out_f32, ref, atol=1e-3, rtol=1e-3), "f32 path mismatch vs reference"

    # Default bf16 operand path (MXU-native; f32 accumulation + f32 epilogue): bf16-level tolerance.
    out_bf16 = sideout_block(x, w1, b1, bn_gamma, bn_beta, bn_mean, bn_var, w2, b2)
    out_bf16 = jax.block_until_ready(out_bf16)
    assert out_bf16.shape == (N, Cout, H, W)
    assert jnp.allclose(out_bf16, ref, atol=2e-2, rtol=2e-2), "bf16 path mismatch vs reference"

    print("KERNEL_OK")
</pallas_src>

<mosaic_0001>
module attributes {stable_mosaic.version = 11 : i64} {
  func.func @sideout_kernel(%arg0: memref<8x896xf32, #tpu.memory_space<vmem>>, %arg1: memref<8x72xf32, #tpu.memory_space<vmem>>, %arg2: memref<8x1xf32, #tpu.memory_space<vmem>>, %arg3: memref<8x8xf32, #tpu.memory_space<vmem>>, %arg4: memref<8x1xf32, #tpu.memory_space<vmem>>, %arg5: memref<8x768xf32, #tpu.memory_space<vmem>>, %arg6: memref<72x768xf32, #tpu.memory_space<vmem>>) attributes {dimension_semantics = [], scalar_prefetch = 0 : i64, scratch_operands = 1 : i64, tpu.core_type = #tpu.core_type<tc>} {
    %c0 = arith.constant 0 : index
    %c0_0 = arith.constant 0 : index
    %0 = vector.load %arg0[%c0, %c0_0] : memref<8x896xf32, #tpu.memory_space<vmem>>, vector<8x768xf32>
    %c0_1 = arith.constant 0 : index
    %c0_2 = arith.constant 0 : index
    %1 = vector.load %arg6[%c0_1, %c0_2] : memref<72x768xf32, #tpu.memory_space<vmem>>, vector<8x768xf32>
    tpu.vector_store %arg6[%c0_1, %c0_2], %0 {strides = array<i32>} : memref<72x768xf32, #tpu.memory_space<vmem>>, vector<8x768xf32>,
    %c0_3 = arith.constant 0 : index
    %c1 = arith.constant 1 : index
    %2 = vector.load %arg0[%c0_3, %c1] : memref<8x896xf32, #tpu.memory_space<vmem>>, vector<8x768xf32>
    %c8 = arith.constant 8 : index
    %c0_4 = arith.constant 0 : index
    %3 = vector.load %arg6[%c8, %c0_4] : memref<72x768xf32, #tpu.memory_space<vmem>>, vector<8x768xf32>
    tpu.vector_store %arg6[%c8, %c0_4], %2 {strides = array<i32>} : memref<72x768xf32, #tpu.memory_space<vmem>>, vector<8x768xf32>,
    %c0_5 = arith.constant 0 : index
    %c2 = arith.constant 2 : index
    %4 = vector.load %arg0[%c0_5, %c2] : memref<8x896xf32, #tpu.memory_space<vmem>>, vector<8x768xf32>
    %c16 = arith.constant 16 : index
    %c0_6 = arith.constant 0 : index
    %5 = vector.load %arg6[%c16, %c0_6] : memref<72x768xf32, #tpu.memory_space<vmem>>, vector<8x768xf32>
    tpu.vector_store %arg6[%c16, %c0_6], %4 {strides = array<i32>} : memref<72x768xf32, #tpu.memory_space<vmem>>, vector<8x768xf32>,
    %c0_7 = arith.constant 0 : index
    %c18 = arith.constant 18 : index
    %6 = vector.load %arg0[%c0_7, %c18] : memref<8x896xf32, #tpu.memory_space<vmem>>, vector<8x768xf32>
    %c24 = arith.constant 24 : index
    %c0_8 = arith.constant 0 : index
    %7 = vector.load %arg6[%c24, %c0_8] : memref<72x768xf32, #tpu.memory_space<vmem>>, vector<8x768xf32>
    tpu.vector_store %arg6[%c24, %c0_8], %6 {strides = array<i32>} : memref<72x768xf32, #tpu.memory_space<vmem>>, vector<8x768xf32>,
    %c0_9 = arith.constant 0 : index
    %c19 = arith.constant 19 : index
    %8 = vector.load %arg0[%c0_9, %c19] : memref<8x896xf32, #tpu.memory_space<vmem>>, vector<8x768xf32>
    %c32 = arith.constant 32 : index
    %c0_10 = arith.constant 0 : index
    %9 = vector.load %arg6[%c32, %c0_10] : memref<72x768xf32, #tpu.memory_space<vmem>>, vector<8x768xf32>
    tpu.vector_store %arg6[%c32, %c0_10], %8 {strides = array<i32>} : memref<72x768xf32, #tpu.memory_space<vmem>>, vector<8x768xf32>,
    %c0_11 = arith.constant 0 : index
    %c20 = arith.constant 20 : index
    %10 = vector.load %arg0[%c0_11, %c20] : memref<8x896xf32, #tpu.memory_space<vmem>>, vector<8x768xf32>
    %c40 = arith.constant 40 : index
    %c0_12 = arith.constant 0 : index
    %11 = vector.load %arg6[%c40, %c0_12] : memref<72x768xf32, #tpu.memory_space<vmem>>, vector<8x768xf32>
    tpu.vector_store %arg6[%c40, %c0_12], %10 {strides = array<i32>} : memref<72x768xf32, #tpu.memory_space<vmem>>, vector<8x768xf32>,
    %c0_13 = arith.constant 0 : index
    %c36 = arith.constant 36 : index
    %12 = vector.load %arg0[%c0_13, %c36] : memref<8x896xf32, #tpu.memory_space<vmem>>, vector<8x768xf32>
    %c48 = arith.constant 48 : index
    %c0_14 = arith.constant 0 : index
    %13 = vector.load %arg6[%c48, %c0_14] : memref<72x768xf32, #tpu.memory_space<vmem>>, vector<8x768xf32>
    tpu.vector_store %arg6[%c48, %c0_14], %12 {strides = array<i32>} : memref<72x768xf32, #tpu.memory_space<vmem>>, vector<8x768xf32>,
    %c0_15 = arith.constant 0 : index
    %c37 = arith.constant 37 : index
    %14 = vector.load %arg0[%c0_15, %c37] : memref<8x896xf32, #tpu.memory_space<vmem>>, vector<8x768xf32>
    %c56 = arith.constant 56 : index
    %c0_16 = arith.constant 0 : index
    %15 = vector.load %arg6[%c56, %c0_16] : memref<72x768xf32, #tpu.memory_space<vmem>>, vector<8x768xf32>
    tpu.vector_store %arg6[%c56, %c0_16], %14 {strides = array<i32>} : memref<72x768xf32, #tpu.memory_space<vmem>>, vector<8x768xf32>,
    %c0_17 = arith.constant 0 : index
    %c38 = arith.constant 38 : index
    %16 = vector.load %arg0[%c0_17, %c38] : memref<8x896xf32, #tpu.memory_space<vmem>>, vector<8x768xf32>
    %c64 = arith.constant 64 : index
    %c0_18 = arith.constant 0 : index
    %17 = vector.load %arg6[%c64, %c0_18] : memref<72x768xf32, #tpu.memory_space<vmem>>, vector<8x768xf32>
    tpu.vector_store %arg6[%c64, %c0_18], %16 {strides = array<i32>} : memref<72x768xf32, #tpu.memory_space<vmem>>, vector<8x768xf32>,
    %c0_19 = arith.constant 0 : index
    %c0_20 = arith.constant 0 : index
    %18 = vector.load %arg1[%c0_19, %c0_20] : memref<8x72xf32, #tpu.memory_space<vmem>>, vector<8x72xf32>
    %c0_21 = arith.constant 0 : index
    %c0_22 = arith.constant 0 : index
    %19 = vector.load %arg6[%c0_21, %c0_22] : memref<72x768xf32, #tpu.memory_space<vmem>>, vector<72x768xf32>
    %cst = arith.constant dense<0.000000e+00> : vector<8x768xf32>
    %20 = tpu.matmul %18, %19, %cst {dimension_numbers = #tpu.dot_dimension_numbers<[1], [0], [0], [1], [0, 0, 1, 1], [], []>} : vector<8x72xf32>, vector<72x768xf32>, vector<8x768xf32> -> vector<8x768xf32>
    %c0_23 = arith.constant 0 : index
    %c0_24 = arith.constant 0 : index
    %21 = vector.load %arg2[%c0_23, %c0_24] : memref<8x1xf32, #tpu.memory_space<vmem>>, vector<8x1xf32>
    %22 = vector.broadcast %21 : vector<8x1xf32> to vector<8x768xf32>
    %23 = arith.addf %20, %22 : vector<8x768xf32>
    %cst_25 = arith.constant 0.000000e+00 : f32
    %24 = vector.broadcast %cst_25 : f32 to vector<8x768xf32>
    %25 = arith.maximumf %23, %24 : vector<8x768xf32>
    %c0_26 = arith.constant 0 : index
    %c0_27 = arith.constant 0 : index
    %26 = vector.load %arg3[%c0_26, %c0_27] : memref<8x8xf32, #tpu.memory_space<vmem>>, vector<8x8xf32>
    %cst_28 = arith.constant dense<0.000000e+00> : vector<8x768xf32>
    %27 = tpu.matmul %26, %25, %cst_28 {dimension_numbers = #tpu.dot_dimension_numbers<[1], [0], [0], [1], [0, 0, 1, 1], [], []>} : vector<8x8xf32>, vector<8x768xf32>, vector<8x768xf32> -> vector<8x768xf32>
    %c0_29 = arith.constant 0 : index
    %c0_30 = arith.constant 0 : index
    %28 = vector.load %arg4[%c0_29, %c0_30] : memref<8x1xf32, #tpu.memory_space<vmem>>, vector<8x1xf32>
    %29 = vector.broadcast %28 : vector<8x1xf32> to vector<8x768xf32>
    %30 = arith.addf %27, %29 : vector<8x768xf32>
    %c0_31 = arith.constant 0 : index
    %c0_32 = arith.constant 0 : index
    %31 = vector.load %arg5[%c0_31, %c0_32] : memref<8x768xf32, #tpu.memory_space<vmem>>, vector<8x768xf32>
    tpu.vector_store %arg5[%c0_31, %c0_32], %30 {strides = array<i32>} : memref<8x768xf32, #tpu.memory_space<vmem>>, vector<8x768xf32>,
    return
  }
}

</mosaic_0001>

<bundles_post_ra>
// kernel: tpu_custom_call.1
= control target key start
LH: loop header
LB: loop body
LE: loop exit
PB: predicated region body
PF: predicated region fallthrough
CT: control target
= control target key end

     0   :  { %10 = vsyncpa [#allocation4], 0  ;;  %s1293_s0 = inlined_call_operand.hbm [shape: f32[8,896], index: 0, kind: input, shape index: {}]   ;;  %s1294_s1 = inlined_call_operand.vmem [shape: f32[8,72], index: 1, kind: input, shape index: {}]   ;;  %s1295_s2 = inlined_call_operand.vmem [shape: f32[8,1], index: 2, kind: input, shape index: {}]   ;;  %s1296_s3 = inlined_call_operand.vmem [shape: f32[8,8], index: 3, kind: input, shape index: {}]   ;;  %s1297_s4 = inlined_call_operand.vmem [shape: f32[8,1], index: 4, kind: input, shape index: {}]   ;;  %s1298_s5 = inlined_call_operand.hbm [shape: f32[8,768], index: 5, kind: output, shape index: {}]  }
   0x1   :  { %11 = vsyncpa [#allocation5], 0  ;;  %s1014_s18 = smov [#allocation3]  }
   0x2   :  { %s18_s19 = sshll.u32 %s1014_s18, 4  ;;  %s19_s19 = int_to_ptr.vmem [resolvable:$true] %s18_s19 }
   0x3   :  { %s978_s20 = scalar_lea.vmem %s19_s19, 896  ;;  %p983_p1 = scmp.lt.s32.totalorder %s19_s19, %s19_s19 }
   0x4   :  { %p979_p0 = scmp.ne.s32.totalorder %s19_s19, %s978_s20  ;;  %p984_p2 = scmp.lt.s32.totalorder %s978_s20, %s978_s20 }
   0x6   :  { %p985_p3 = por %p984_p2, %p983_p1 }
   0x8   :  { %p986_p4 = pnand %p985_p3, %p979_p0 }
   0xa   :  { %989 = shalt.err (!%p986_p4)
}
   0xb   :  { %21 = dma.hbm_to_vmem [thread:$0]  %s1293_s0, 896, %s19_s19, [#allocation4]  }
   0xc   :  { %1010 = dma.done.wait [#allocation4], 896  }
   0xd   :  { %1011 = vsyncadd [#allocation4], 4294966400  ;;  %v1059_v0 = vld [vmem:[#allocation3 + $0x8] sm:$0xff]  ;;  %v1061_v1 = vld [vmem:[#allocation3] sm:$0xff]  ;;  %s1015_s23 = smov 90   ;;  %s1016_s24 = smov 91  }
   0xe   :  { %390 = vrot.lane.b32.xlu0 %v1059_v0, %s1015_s23  ;;  %388 = vrot.lane.b32.xlu1 %v1061_v1, %s1015_s23  ;;  %v1067_v2 = vld [vmem:[#allocation3 + $0x10] sm:$0xff]  ;;  %s1017_s0 = smov 92   ;;  %s1018_s25 = smov 108   ;;  %v1109_v3 = vld [vmem:[#allocation3 + $0x18] sm:$0xff]  ;;  %v1115_v4 = vld [vmem:[#allocation3 + $0x20] sm:$0xff]  ;;  %v1023_v5 = vmov 0.0  }
   0xf   :  { %s1019_s26 = smov 109   ;;  %s1020_s27 = smov 110   ;;  %550 = vmatprep.mubr.f32.mxu0 %v1023_v5  ;;  %621 = vmatprep.mubr.f32.mxu1 %v1023_v5  ;;  %v1131_v6 = vld [vmem:[#allocation3 + $0x28] sm:$0xff]  ;;  %v380_v7 = vld [vmem:[#allocation3 + $0x30] sm:$0xff]  ;;  %v1024_v8 = vmov 0   ;;  %v476_v9 = vld [vmem:[%s1295_s2] sm:$0xff] }
  0x10   :  { %s1021_s28 = smov 126   ;;  %s1022_s29 = smov 127   ;;  %968 = vset.pattern.permute.xlu0 %v1024_v8  ;;  %969 = vset.pattern.permute.xlu1 %v1024_v8  ;;  %vm402_vm0 = vcmask 736256   ;;  %vm355_vm1 = vcmask 744448   ;;  %vm308_vm2 = vcmask 752640   ;;  %vm261_vm3 = vcmask 883712  }
  0x11   :  { %vm214_vm4 = vcmask 891904   ;;  %vm167_vm5 = vcmask 900096   ;;  %vm120_vm6 = vcmask 1031168   ;;  %vm73_vm7 = vcmask 1039360   ;;  %v1226_v54 = vld [vmem:[%s1294_s1] sm:$0xff] }
  0x12   :  { %392 = vrot.lane.b32.xlu0 %v1067_v2, %s1015_s23  ;;  %343 = vrot.lane.b32.xlu1 %v1059_v0, %s1016_s24  ;;  %vm482_vm8 = vcmask 588800   ;;  %vm712_vm9 = vcmask 64512  }
  0x16   :  { %345 = vrot.lane.b32.xlu0 %v1067_v2, %s1016_s24  ;;  %341 = vrot.lane.b32.xlu1 %v1061_v1, %s1016_s24 }
  0x1a   :  { %298 = vrot.lane.b32.xlu1 %v1067_v2, %s1017_s0  ;;  %296 = vrot.lane.b32.xlu0 %v1059_v0, %s1017_s0 }
  0x1e   :  { %294 = vrot.lane.b32.xlu0 %v1061_v1, %s1017_s0  ;;  %249 = vrot.lane.b32.xlu1 %v1059_v0, %s1018_s25 }
  0x22   :  { %251 = vrot.lane.b32.xlu0 %v1067_v2, %s1018_s25  ;;  %247 = vrot.lane.b32.xlu1 %v1061_v1, %s1018_s25 }
  0x26   :  { %204 = vrot.lane.b32.xlu1 %v1067_v2, %s1019_s26  ;;  %202 = vrot.lane.b32.xlu0 %v1059_v0, %s1019_s26 }
  0x2a   :  { %200 = vrot.lane.b32.xlu0 %v1061_v1, %s1019_s26  ;;  %155 = vrot.lane.b32.xlu1 %v1059_v0, %s1020_s27 }
  0x2e   :  { %157 = vrot.lane.b32.xlu0 %v1067_v2, %s1020_s27  ;;  %153 = vrot.lane.b32.xlu1 %v1061_v1, %s1020_s27 }
  0x32   :  { %110 = vrot.lane.b32.xlu1 %v1067_v2, %s1021_s28  ;;  %108 = vrot.lane.b32.xlu0 %v1059_v0, %s1021_s28 }
  0x36   :  { %106 = vrot.lane.b32.xlu0 %v1061_v1, %s1021_s28  ;;  %61 = vrot.lane.b32.xlu1 %v1059_v0, %s1022_s29 }
  0x3a   :  { %63 = vrot.lane.b32.xlu0 %v1067_v2, %s1022_s29  ;;  %394 = vrot.lane.b32.xlu1 %v1109_v3, %s1015_s23 }
  0x3e   :  { %396 = vrot.lane.b32.xlu0 %v1115_v4, %s1015_s23  ;;  %59 = vrot.lane.b32.xlu1 %v1061_v1, %s1022_s29 }
  0x42   :  { %347 = vrot.lane.b32.xlu0 %v1109_v3, %s1016_s24  ;;  %349 = vrot.lane.b32.xlu1 %v1115_v4, %s1016_s24 }
  0x46   :  { %300 = vrot.lane.b32.xlu0 %v1109_v3, %s1017_s0  ;;  %302 = vrot.lane.b32.xlu1 %v1115_v4, %s1017_s0 }
  0x4a   :  { %398 = vrot.lane.b32.xlu0 %v1131_v6, %s1015_s23  ;;  %400 = vrot.lane.b32.xlu1 %v380_v7, %s1015_s23 }
  0x4e   :  { %253 = vrot.lane.b32.xlu0 %v1109_v3, %s1018_s25  ;;  %255 = vrot.lane.b32.xlu1 %v1115_v4, %s1018_s25 }
  0x52   :  { %351 = vrot.lane.b32.xlu0 %v1131_v6, %s1016_s24  ;;  %353 = vrot.lane.b32.xlu1 %v380_v7, %s1016_s24 }
  0x56   :  { %206 = vrot.lane.b32.xlu0 %v1109_v3, %s1019_s26  ;;  %208 = vrot.lane.b32.xlu1 %v1115_v4, %s1019_s26 }
  0x5a   :  { %304 = vrot.lane.b32.xlu0 %v1131_v6, %s1017_s0  ;;  %306 = vrot.lane.b32.xlu1 %v380_v7, %s1017_s0 }
  0x5e   :  { %159 = vrot.lane.b32.xlu0 %v1109_v3, %s1020_s27  ;;  %161 = vrot.lane.b32.xlu1 %v1115_v4, %s1020_s27 }
  0x62   :  { %257 = vrot.lane.b32.xlu0 %v1131_v6, %s1018_s25  ;;  %259 = vrot.lane.b32.xlu1 %v380_v7, %s1018_s25 }
  0x66   :  { %112 = vrot.lane.b32.xlu0 %v1109_v3, %s1021_s28  ;;  %114 = vrot.lane.b32.xlu1 %v1115_v4, %s1021_s28 }
  0x6a   :  { %210 = vrot.lane.b32.xlu0 %v1131_v6, %s1019_s26  ;;  %212 = vrot.lane.b32.xlu1 %v380_v7, %s1019_s26 }
  0x6e   :  { %65 = vrot.lane.b32.xlu0 %v1109_v3, %s1022_s29  ;;  %67 = vrot.lane.b32.xlu1 %v1115_v4, %s1022_s29 }
  0x72   :  { %163 = vrot.lane.b32.xlu0 %v1131_v6, %s1020_s27  ;;  %165 = vrot.lane.b32.xlu1 %v380_v7, %s1020_s27 }
  0x76   :  { %116 = vrot.lane.b32.xlu0 %v1131_v6, %s1021_s28  ;;  %118 = vrot.lane.b32.xlu1 %v380_v7, %s1021_s28 }
  0x7a   :  { %69 = vrot.lane.b32.xlu0 %v1131_v6, %s1022_s29  ;;  %71 = vrot.lane.b32.xlu1 %v380_v7, %s1022_s29 }
  0x7e   :  { %479 = vperm.xlu0 %968, %v476_v9  }
  0x80   :  { %v391_v10 = vpop.permute.xlu0 %390  ;;  %v389_v11 = vpop.permute.xlu1 %388 }
  0x81   :  { %v403_v15 = vsel %vm402_vm0, %v389_v11, %v391_v10 }
  0x84   :  { %v1180_v12 = vpop.permute.xlu0 %392  ;;  %v344_v13 = vpop.permute.xlu1 %343 }
  0x85   :  { %v404_v14 = vsel %vm402_vm0, %v391_v10, %v1180_v12 }
  0x86   :  { %500 = vmatprep.subr.mxu0 %v404_v14 }
  0x87   :  { %501 = vmatpush1.msra.mxu0 %v403_v15 }
  0x88   :  { %v1185_v16 = vpop.permute.xlu0 %345  ;;  %v342_v17 = vpop.permute.xlu1 %341 }
  0x89   :  { %v357_v18 = vsel %vm355_vm1, %v344_v13, %v1185_v16  ;;  %v356_v19 = vsel %vm355_vm1, %v342_v17, %v344_v13 }
  0x8a   :  { %502 = vmatprep.subr.mxu0 %v357_v18 }
  0x8b   :  { %503 = vmatpush1.msra.mxu0 %v356_v19 }
  0x8c   :  { %v1190_v20 = vpop.permute.xlu1 %298  ;;  %v297_v21 = vpop.permute.xlu0 %296 }
  0x8d   :  { %v310_v22 = vsel %vm308_vm2, %v297_v21, %v1190_v20 }
  0x8e   :  { %504 = vmatprep.subr.mxu0 %v310_v22 }
  0x90   :  { %v295_v23 = vpop.permute.xlu0 %294  ;;  %v250_v24 = vpop.permute.xlu1 %249 }
  0x91   :  { %v309_v25 = vsel %vm308_vm2, %v295_v23, %v297_v21 }
  0x92   :  { %505 = vmatpush1.msra.mxu0 %v309_v25 }
  0x94   :  { %v1195_v26 = vpop.permute.xlu0 %251  ;;  %v248_v27 = vpop.permute.xlu1 %247 }
  0x95   :  { %v263_v28 = vsel %vm261_vm3, %v250_v24, %v1195_v26  ;;  %v262_v29 = vsel %vm261_vm3, %v248_v27, %v250_v24 }
  0x96   :  { %506 = vmatprep.subr.mxu0 %v263_v28 }
  0x97   :  { %507 = vmatpush1.msra.mxu0 %v262_v29 }
  0x98   :  { %v1200_v30 = vpop.permute.xlu1 %204  ;;  %v203_v31 = vpop.permute.xlu0 %202 }
  0x99   :  { %v216_v32 = vsel %vm214_vm4, %v203_v31, %v1200_v30 }
  0x9a   :  { %508 = vmatprep.subr.mxu0 %v216_v32 }
  0x9c   :  { %v201_v33 = vpop.permute.xlu0 %200  ;;  %v156_v34 = vpop.permute.xlu1 %155 }
  0x9d   :  { %v215_v35 = vsel %vm214_vm4, %v201_v33, %v203_v31 }
  0x9e   :  { %509 = vmatpush1.msra.mxu0 %v215_v35 }
  0xa0   :  { %v1205_v36 = vpop.permute.xlu0 %157  ;;  %v154_v37 = vpop.permute.xlu1 %153 }
  0xa1   :  { %v169_v38 = vsel %vm167_vm5, %v156_v34, %v1205_v36  ;;  %v168_v39 = vsel %vm167_vm5, %v154_v37, %v156_v34 }
  0xa2   :  { %510 = vmatprep.subr.mxu0 %v169_v38 }
  0xa3   :  { %511 = vmatpush1.msra.mxu0 %v168_v39 }
  0xa4   :  { %v1210_v40 = vpop.permute.xlu1 %110  ;;  %v109_v41 = vpop.permute.xlu0 %108 }
  0xa5   :  { %v122_v42 = vsel %vm120_vm6, %v109_v41, %v1210_v40 }
  0xa6   :  { %512 = vmatprep.subr.mxu0 %v122_v42 }
  0xa8   :  { %v107_v43 = vpop.permute.xlu0 %106  ;;  %v62_v44 = vpop.permute.xlu1 %61 }
  0xa9   :  { %v121_v45 = vsel %vm120_vm6, %v107_v43, %v109_v41 }
  0xaa   :  { %513 = vmatpush1.msra.mxu0 %v121_v45 }
  0xac   :  { %v1215_v46 = vpop.permute.xlu0 %63  ;;  %v395_v47 = vpop.permute.xlu1 %394 }
  0xad   :  { %v75_v48 = vsel %vm73_vm7, %v62_v44, %v1215_v46  ;;  %v405_v53 = vsel %vm402_vm0, %v1180_v12, %v395_v47 }
  0xae   :  { %514 = vmatprep.subr.mxu0 %v75_v48 }
  0xb0   :  { %v397_v49 = vpop.permute.xlu0 %396  ;;  %v60_v50 = vpop.permute.xlu1 %59 }
  0xb1   :  { %v74_v51 = vsel %vm73_vm7, %v60_v50, %v62_v44  ;;  %v406_v52 = vsel %vm402_vm0, %v395_v47, %v397_v49 }
  0xb2   :  { %515 = vmatpush1.msra.mxu0 %v74_v51  ;;  %571 = vmatprep.subr.mxu1 %v406_v52 }
  0xb3   :  { %572 = vmatpush1.msra.mxu1 %v405_v53  ;;  %516 = vmatprep.subr.mxu0 %v1059_v0 }
  0xb4   :  { %v348_v55 = vpop.permute.xlu0 %347  ;;  %v350_v56 = vpop.permute.xlu1 %349  ;;  %517 = vmatpush1.msra.mxu0 %v1061_v1 }
  0xb5   :  { %v359_v57 = vsel %vm355_vm1, %v348_v55, %v350_v56  ;;  %v358_v58 = vsel %vm355_vm1, %v1185_v16, %v348_v55  ;;  %950 = vmatmul.mubr.msk.f32.vlgmr.msra.gmra.mxu0 %vm482_vm8, %v1226_v54  ;;  %v706_v55 = vld [vmem:[%s1297_s4] sm:$0xff] }
  0xb6   :  { %573 = vmatprep.subr.mxu1 %v359_v57  ;;  %692 = vmatprep.mubr.f32.mxu0 %v1023_v5 }
  0xb7   :  { %574 = vmatpush1.msra.mxu1 %v358_v58  ;;  %709 = vperm.xlu1 %969, %v706_v55  }
  0xb8   :  { %v301_v59 = vpop.permute.xlu0 %300  ;;  %v303_v60 = vpop.permute.xlu1 %302 }
  0xb9   :  { %v312_v61 = vsel %vm308_vm2, %v301_v59, %v303_v60  ;;  %v311_v62 = vsel %vm308_vm2, %v1190_v20, %v301_v59 }
  0xba   :  { %575 = vmatprep.subr.mxu1 %v312_v61 }
  0xbb   :  { %576 = vmatpush1.msra.mxu1 %v311_v62 }
  0xbc   :  { %v399_v63 = vpop.permute.xlu0 %398  ;;  %v401_v0 = vpop.permute.xlu1 %400 }
  0xbd   :  { %v407_v1 = vsel %vm402_vm0, %v397_v49, %v399_v63  ;;  %v408_v7 = vsel %vm402_vm0, %v399_v63, %v401_v0 }
  0xbe   :  { %642 = vmatprep.subr.mxu0 %v408_v7 }
  0xbf   :  { %643 = vmatpush1.msra.mxu0 %v407_v1 }
  0xc0   :  { %v254_v8 = vpop.permute.xlu0 %253  ;;  %v256_v9 = vpop.permute.xlu1 %255 }
  0xc1   :  { %v265_v10 = vsel %vm261_vm3, %v254_v8, %v256_v9  ;;  %v264_v11 = vsel %vm261_vm3, %v1195_v26, %v254_v8 }
  0xc2   :  { %577 = vmatprep.subr.mxu1 %v265_v10 }
  0xc3   :  { %578 = vmatpush1.msra.mxu1 %v264_v11 }
  0xc4   :  { %v352_v12 = vpop.permute.xlu0 %351  ;;  %v354_v13 = vpop.permute.xlu1 %353 }
  0xc5   :  { %v360_v14 = vsel %vm355_vm1, %v350_v56, %v352_v12  ;;  %v361_v15 = vsel %vm355_vm1, %v352_v12, %v354_v13 }
  0xc6   :  { %644 = vmatprep.subr.mxu0 %v361_v15 }
  0xc7   :  { %645 = vmatpush1.msra.mxu0 %v360_v14 }
  0xc8   :  { %v207_v16 = vpop.permute.xlu0 %206  ;;  %v209_v17 = vpop.permute.xlu1 %208 }
  0xc9   :  { %v218_v18 = vsel %vm214_vm4, %v207_v16, %v209_v17  ;;  %v217_v19 = vsel %vm214_vm4, %v1200_v30, %v207_v16 }
  0xca   :  { %579 = vmatprep.subr.mxu1 %v218_v18 }
  0xcb   :  { %580 = vmatpush1.msra.mxu1 %v217_v19 }
  0xcc   :  { %v305_v20 = vpop.permute.xlu0 %304  ;;  %v307_v21 = vpop.permute.xlu1 %306 }
  0xcd   :  { %v313_v22 = vsel %vm308_vm2, %v303_v60, %v305_v20  ;;  %v314_v23 = vsel %vm308_vm2, %v305_v20, %v307_v21 }
  0xce   :  { %646 = vmatprep.subr.mxu0 %v314_v23 }
  0xcf   :  { %647 = vmatpush1.msra.mxu0 %v313_v22 }
  0xd0   :  { %v160_v24 = vpop.permute.xlu0 %159  ;;  %v162_v25 = vpop.permute.xlu1 %161 }
  0xd1   :  { %v171_v26 = vsel %vm167_vm5, %v160_v24, %v162_v25  ;;  %v170_v27 = vsel %vm167_vm5, %v1205_v36, %v160_v24 }
  0xd2   :  { %581 = vmatprep.subr.mxu1 %v171_v26 }
  0xd3   :  { %582 = vmatpush1.msra.mxu1 %v170_v27 }
  0xd4   :  { %v258_v28 = vpop.permute.xlu0 %257  ;;  %v260_v29 = vpop.permute.xlu1 %259 }
  0xd5   :  { %v266_v30 = vsel %vm261_vm3, %v256_v9, %v258_v28  ;;  %v267_v31 = vsel %vm261_vm3, %v258_v28, %v260_v29 }
  0xd6   :  { %648 = vmatprep.subr.mxu0 %v267_v31 }
  0xd7   :  { %649 = vmatpush1.msra.mxu0 %v266_v30 }
  0xd8   :  { %v113_v32 = vpop.permute.xlu0 %112  ;;  %v115_v33 = vpop.permute.xlu1 %114 }
  0xd9   :  { %v124_v34 = vsel %vm120_vm6, %v113_v32, %v115_v33  ;;  %v123_v35 = vsel %vm120_vm6, %v1210_v40, %v113_v32 }
  0xda   :  { %583 = vmatprep.subr.mxu1 %v124_v34 }
  0xdb   :  { %584 = vmatpush1.msra.mxu1 %v123_v35 }
  0xdc   :  { %v211_v36 = vpop.permute.xlu0 %210  ;;  %v213_v37 = vpop.permute.xlu1 %212 }
  0xdd   :  { %v219_v38 = vsel %vm214_vm4, %v209_v17, %v211_v36  ;;  %v220_v39 = vsel %vm214_vm4, %v211_v36, %v213_v37 }
  0xde   :  { %650 = vmatprep.subr.mxu0 %v220_v39 }
  0xdf   :  { %651 = vmatpush1.msra.mxu0 %v219_v38 }
  0xe0   :  { %v66_v41 = vpop.permute.xlu0 %65  ;;  %v68_v42 = vpop.permute.xlu1 %67 }
  0xe1   :  { %v77_v43 = vsel %vm73_vm7, %v66_v41, %v68_v42  ;;  %v76_v44 = vsel %vm73_vm7, %v1215_v46, %v66_v41 }
  0xe2   :  { %585 = vmatprep.subr.mxu1 %v77_v43 }
  0xe3   :  { %586 = vmatpush1.msra.mxu1 %v76_v44 }
  0xe4   :  { %v164_v40 = vpop.permute.xlu0 %163  ;;  %v166_v45 = vpop.permute.xlu1 %165  ;;  %587 = vmatprep.subr.mxu1 %v1109_v3 }
  0xe5   :  { %v172_v47 = vsel %vm167_vm5, %v162_v25, %v164_v40  ;;  %v173_v48 = vsel %vm167_vm5, %v164_v40, %v166_v45  ;;  %588 = vmatpush1.msra.mxu1 %v1067_v2 }
  0xe6   :  { %652 = vmatprep.subr.mxu0 %v173_v48  ;;  %951 = vmatmul.mubr.msk.f32.vlgmr.msra.gmra.mxu1 %vm482_vm8, %v1226_v54 }
  0xe7   :  { %653 = vmatpush1.msra.mxu0 %v172_v47  ;;  %780 = vmatprep.mubr.f32.mxu1 %v1023_v5 }
  0xe8   :  { %v117_v46 = vpop.permute.xlu0 %116  ;;  %v119_v49 = vpop.permute.xlu1 %118 }
  0xe9   :  { %v125_v50 = vsel %vm120_vm6, %v115_v33, %v117_v46  ;;  %v126_v51 = vsel %vm120_vm6, %v117_v46, %v119_v49 }
  0xea   :  { %654 = vmatprep.subr.mxu0 %v126_v51 }
  0xeb   :  { %655 = vmatpush1.msra.mxu0 %v125_v50 }
  0xec   :  { %v70_v3 = vpop.permute.xlu0 %69  ;;  %v72_v52 = vpop.permute.xlu1 %71 }
  0xed   :  { %v78_v53 = vsel %vm73_vm7, %v68_v42, %v70_v3  ;;  %v79_v2 = vsel %vm73_vm7, %v70_v3, %v72_v52 }
  0xee   :  { %656 = vmatprep.subr.mxu0 %v79_v2 }
  0xef   :  { %657 = vmatpush1.msra.mxu0 %v78_v53 }
  0xf0   :  { %658 = vmatprep.subr.mxu0 %v1131_v6  ;;  %v705_v6 = vld [vmem:[%s1296_s3] sm:$0xff]  ;;  %s1025_s3 = smov [#allocation6]  }
  0xf1   :  { %659 = vmatpush1.msra.mxu0 %v1115_v4  ;;  %s941_s4 = sshll.u32 %s1025_s3, 4  ;;  %s942_s4 = int_to_ptr.vmem [resolvable:$true] %s941_s4 }
  0xf2   :  { %952 = vmatmul.mubr.msk.f32.vlgmr.msra.gmra.mxu0 %vm482_vm8, %v1226_v54  ;;  %s990_s11 = scalar_lea.vmem %s942_s4, 768  ;;  %p995_p6 = scmp.lt.s32.totalorder %s942_s4, %s942_s4 }
  0xf3   :  { %p991_p5 = scmp.ne.s32.totalorder %s942_s4, %s990_s11  ;;  %p996_p7 = scmp.lt.s32.totalorder %s990_s11, %s990_s11 }
  0xf5   :  { %p997_p8 = por %p996_p7, %p995_p6 }
  0xf7   :  { %p998_p9 = pnand %p997_p8, %p991_p5 }
  0xf9   :  { %v480_v56 = vpop.permute.xlu0 %479 }
 0x132   :  { %v710_v14 = vpop.permute.xlu1 %709 }
 0x175   :  { %v552_v57 = vpop.f32.mrf.mxu0 }
 0x176   :  { %v553_v58 = vadd.f32 %v552_v57, %v480_v56 }
 0x177   :  { %v554_v59 = vpop.f32.mrf.mxu0 }
 0x178   :  { %v555_v60 = vadd.f32 %v554_v59, %v480_v56  ;;  %v699_v61 = vmax.f32 %v553_v58, 0.0 }
 0x17a   :  { %v700_v62 = vmax.f32 %v555_v60, 0.0 }
 0x17c   :  { %746 = vmatprep.subr.mxu1 %v700_v62 }
 0x17d   :  { %747 = vmatpush1.msra.mxu1 %v699_v61 }
 0x17e   :  { %953 = vmatmul.mubr.msk.f32.vlgmr.msra.gmra.mxu1 %vm712_vm9, %v705_v6 }
 0x17f   :  { %851 = vmatprep.mubr.f32.mxu1 %v1023_v5 }
 0x1a6   :  { %v623_v4 = vpop.f32.mrf.mxu1 }
 0x1a7   :  { %v624_v54 = vadd.f32 %v623_v4, %v480_v56 }
 0x1a8   :  { %v625_v63 = vpop.f32.mrf.mxu1 }
 0x1a9   :  { %v626_v0 = vadd.f32 %v625_v63, %v480_v56  ;;  %v701_v1 = vmax.f32 %v624_v54, 0.0 }
 0x1ab   :  { %v702_v7 = vmax.f32 %v626_v0, 0.0 }
 0x1ad   :  { %817 = vmatprep.subr.mxu1 %v702_v7 }
 0x1ae   :  { %818 = vmatpush1.msra.mxu1 %v701_v1 }
 0x1af   :  { %954 = vmatmul.mubr.msk.f32.vlgmr.msra.gmra.mxu1 %vm712_vm9, %v705_v6 }
 0x1b0   :  { %922 = vmatprep.mubr.f32.mxu1 %v1023_v5 }
 0x1b2   :  { %v694_v8 = vpop.f32.mrf.mxu0 }
 0x1b3   :  { %v695_v9 = vadd.f32 %v694_v8, %v480_v56 }
 0x1b4   :  { %v696_v10 = vpop.f32.mrf.mxu0 }
 0x1b5   :  { %v697_v11 = vadd.f32 %v696_v10, %v480_v56  ;;  %v703_v13 = vmax.f32 %v695_v9, 0.0 }
 0x1b7   :  { %v704_v12 = vmax.f32 %v697_v11, 0.0 }
 0x1b9   :  { %888 = vmatprep.subr.mxu1 %v704_v12 }
 0x1ba   :  { %889 = vmatpush1.msra.mxu1 %v703_v13 }
 0x1bb   :  { %955 = vmatmul.mubr.msk.f32.vlgmr.msra.gmra.mxu1 %vm712_vm9, %v705_v6 }
 0x23e   :  { %v782_v15 = vpop.f32.mrf.mxu1 }
 0x23f   :  { %v783_v16 = vadd.f32 %v782_v15, %v710_v14 }
 0x240   :  { %v784_v17 = vpop.f32.mrf.mxu1 }
 0x241   :  { %929 = vst [vmem:[#allocation6] sm:$0xff] %v783_v16  ;;  %v785_v18 = vadd.f32 %v784_v17, %v710_v14 }
 0x243   :  { %930 = vst [vmem:[#allocation6 + $0x8] sm:$0xff] %v785_v18 }
 0x26f   :  { %v853_v19 = vpop.f32.mrf.mxu1 }
 0x270   :  { %v854_v20 = vadd.f32 %v853_v19, %v710_v14 }
 0x271   :  { %v855_v5 = vpop.f32.mrf.mxu1 }
 0x272   :  { %931 = vst [vmem:[#allocation6 + $0x10] sm:$0xff] %v854_v20  ;;  %v856_v21 = vadd.f32 %v855_v5, %v710_v14 }
 0x274   :  { %932 = vst [vmem:[#allocation6 + $0x18] sm:$0xff] %v856_v21 }
 0x27b   :  { %v924_v22 = vpop.f32.mrf.mxu1 }
 0x27c   :  { %v925_v23 = vadd.f32 %v924_v22, %v710_v14 }
 0x27d   :  { %v926_v24 = vpop.f32.mrf.mxu1 }
 0x27e   :  { %933 = vst [vmem:[#allocation6 + $0x20] sm:$0xff] %v925_v23  ;;  %v927_v25 = vadd.f32 %v926_v24, %v710_v14 }
 0x280   :  { %934 = vst [vmem:[#allocation6 + $0x28] sm:$0xff] %v927_v25 }
 0x281   :  { %1001 = shalt.err (!%p998_p9)
}
 0x282   :  { %944 = dma.vmem_to_hbm [thread:$0]  %s942_s4, 768, %s1298_s5, [#allocation5]  }
 0x283   :  { %1012 = dma.done.wait [#allocation5], 768  }
 0x284   :  { %1013 = vsyncadd [#allocation5], 4294966528 }
 0x285   :  { %948 = vsyncpa [#allocation4], 1 }
 0x286   :  { %949 = vsyncpa [#allocation5], 1 }

</bundles_post_ra>
